<compile_context>
chip_gen: v5e
topology: v5e:2x2
jax: 0.10.0
libtpu: 0.0.40
codegen_flags: <defaults>
</compile_context>

<pallas_src>
import jax
import jax.numpy as jnp
from jax.experimental import pallas as pl
from jax.experimental.pallas import tpu as pltpu


def _round_up(n, m):
    return ((n + m - 1) // m) * m


# --------------------------------------------------------------------------- #
# Kernel: fused MLP, one batch tile per grid step.
# --------------------------------------------------------------------------- #
def _mlp_kernel(x_ref,
                w1_ref, t1_ref,
                w2_ref, t2_ref,
                w3_ref, t3_ref,
                wc_ref, bc_ref,
                out_ref):
    h = x_ref[...]                                                   # bf16 (tb, d_in)

    # Layer 1: Linear + folded-BN + ReLU   (Dropout = identity in eval mode)
    h = jnp.dot(h, w1_ref[...], preferred_element_type=jnp.float32)
    h = jnp.maximum(h + t1_ref[...], 0.0).astype(jnp.bfloat16)

    # Layer 2
    h = jnp.dot(h, w2_ref[...], preferred_element_type=jnp.float32)
    h = jnp.maximum(h + t2_ref[...], 0.0).astype(jnp.bfloat16)

    # Layer 3
    h = jnp.dot(h, w3_ref[...], preferred_element_type=jnp.float32)
    h = jnp.maximum(h + t3_ref[...], 0.0).astype(jnp.bfloat16)

    # Classifier (output lane-padded to a multiple of 128)
    out_ref[...] = (jnp.dot(h, wc_ref[...], preferred_element_type=jnp.float32)
                    + bc_ref[...]).astype(out_ref.dtype)


# --------------------------------------------------------------------------- #
# Wrapper
# --------------------------------------------------------------------------- #
def gp_kernel_ship_classification_forward(x, folded, num_classes, *, tile_b=None):
    """x: (B, D_in) float32.  folded: dict from fold_params()."""
    B, d_in = x.shape
    if tile_b is None:
        tile_b = min(128, _round_up(B, 8))      # multiple of 8, capped at 128
    Bp = _round_up(B, tile_b)

    xp = x if Bp == B else jnp.pad(x, ((0, Bp - B), (0, 0)))
    xp = xp.astype(jnp.bfloat16)

    out_pad = folded["bc"].shape[1]             # lane-dense classifier width (128k)

    def tile_spec(d):
        return pl.BlockSpec((tile_b, d), lambda i: (i, 0))

    def full_spec(a):
        # Parameters: same full block at every grid step.
        return pl.BlockSpec(a.shape, lambda i: (0, 0))

    ordered = [folded["w1"], folded["t1"],
               folded["w2"], folded["t2"],
               folded["w3"], folded["t3"],
               folded["wc"], folded["bc"]]

    out = pl.pallas_call(
        _mlp_kernel,
        out_shape=jax.ShapeDtypeStruct((Bp, out_pad), jnp.float32),
        grid_spec=pltpu.PrefetchScalarGridSpec(
            num_scalar_prefetch=0,
            grid=(Bp // tile_b,),
            in_specs=[tile_spec(d_in)] + [full_spec(a) for a in ordered],
            out_specs=tile_spec(out_pad),
        ),
        compiler_params=pltpu.CompilerParams(
            dimension_semantics=("parallel",)),
    )(xp, *ordered)

    return out[:B, :num_classes]


# --------------------------------------------------------------------------- #
# Parameter construction (mimics nn.Linear / nn.BatchNorm1d) and BN folding.
# --------------------------------------------------------------------------- #
def init_raw_params(key, input_dim, num_classes, hidden_dims=(256, 128, 64)):
    params = {}
    dims = [input_dim] + list(hidden_dims)
    keys = jax.random.split(key, 4 * len(hidden_dims) + 2)
    kidx = 0
    for li, (din, dout) in enumerate(zip(dims[:-1], dims[1:]), start=1):
        bound = 1.0 / jnp.sqrt(jnp.float32(din))
        params[f"w{li}"] = jax.random.uniform(keys[kidx], (din, dout),
                                              jnp.float32, -bound, bound); kidx += 1
        params[f"b{li}"] = jax.random.uniform(keys[kidx], (1, dout),
                                              jnp.float32, -bound, bound); kidx += 1
        params[f"gamma{li}"] = 1.0 + 0.1 * jax.random.normal(
            keys[kidx], (1, dout), jnp.float32); kidx += 1
        brv = 0.1 * jax.random.normal(keys[kidx], (3, dout), jnp.float32); kidx += 1
        params[f"beta{li}"] = brv[0:1]
        params[f"rmean{li}"] = brv[1:2]
        params[f"rvar{li}"] = 1.0 + jnp.abs(brv[2:3])
    din = dims[-1]
    bound = 1.0 / jnp.sqrt(jnp.float32(din))
    params["wc"] = jax.random.uniform(keys[kidx], (din, num_classes),
                                      jnp.float32, -bound, bound); kidx += 1
    params["bc"] = jax.random.uniform(keys[kidx], (1, num_classes),
                                      jnp.float32, -bound, bound)
    return params


def fold_params(raw, num_layers=3, eps=1e-5):
    """Fold eval-mode BatchNorm into the Linear weights and pad the classifier
    output to a lane-dense width (multiple of 128).  Weights -> bf16."""
    folded = {}
    for li in range(1, num_layers + 1):
        s = raw[f"gamma{li}"] / jnp.sqrt(raw[f"rvar{li}"] + eps)      # (1, dout)
        t = raw[f"beta{li}"] - raw[f"rmean{li}"] * s
        folded[f"w{li}"] = (raw[f"w{li}"] * s).astype(jnp.bfloat16)   # w' = w * s
        folded[f"t{li}"] = (raw[f"b{li}"] * s + t).astype(jnp.float32)
    num_classes = raw["wc"].shape[1]
    out_pad = _round_up(num_classes, 128)
    wc = jnp.pad(raw["wc"], ((0, 0), (0, out_pad - num_classes)))
    bc = jnp.pad(raw["bc"], ((0, 0), (0, out_pad - num_classes)))
    folded["wc"] = wc.astype(jnp.bfloat16)
    folded["bc"] = bc.astype(jnp.float32)
    return folded


# --------------------------------------------------------------------------- #
# References
# --------------------------------------------------------------------------- #
def reference_forward_f32(x, raw, num_layers=3, eps=1e-5):
    """Exact eval-mode PyTorch semantics in f32."""
    h = x
    for li in range(1, num_layers + 1):
        h = h @ raw[f"w{li}"] + raw[f"b{li}"]
        s = raw[f"gamma{li}"] / jnp.sqrt(raw[f"rvar{li}"] + eps)
        t = raw[f"beta{li}"] - raw[f"rmean{li}"] * s
        h = jnp.maximum(h * s + t, 0.0)
    return h @ raw["wc"] + raw["bc"]


def reference_forward_folded(x, folded, num_classes, num_layers=3):
    """Mirrors the kernel math (bf16 operands, f32 accumulation)."""
    h = x.astype(jnp.bfloat16)
    for li in range(1, num_layers + 1):
        h = jnp.dot(h, folded[f"w{li}"], preferred_element_type=jnp.float32)
        h = jnp.maximum(h + folded[f"t{li}"], 0.0).astype(jnp.bfloat16)
    out = jnp.dot(h, folded["wc"], preferred_element_type=jnp.float32) + folded["bc"]
    return out[:, :num_classes]


# --------------------------------------------------------------------------- #
if __name__ == "__main__":
    B = 16
    INPUT_DIM = 32
    NUM_CLASSES = 10
    HIDDEN = (256, 128, 64)

    key = jax.random.PRNGKey(0)
    kx, kp = jax.random.split(key)
    x = jax.random.normal(kx, (B, INPUT_DIM), jnp.float32)

    raw = init_raw_params(kp, INPUT_DIM, NUM_CLASSES, HIDDEN)
    folded = fold_params(raw)

    out = gp_kernel_ship_classification_forward(x, folded, NUM_CLASSES)
    out = jax.block_until_ready(out)
    assert out.shape == (B, NUM_CLASSES)

    # Tight check vs a reference that mirrors the kernel's bf16/f32 math.
    ref_bf16 = reference_forward_folded(x, folded, NUM_CLASSES)
    assert jnp.allclose(out, ref_bf16, atol=1e-3, rtol=1e-3), "mismatch vs bf16 reference"

    # Loose check vs exact f32 eval-mode module semantics (bf16 quantization only).
    ref_f32 = reference_forward_f32(x, raw)
    assert jnp.allclose(out, ref_f32, atol=5e-2, rtol=5e-2), "mismatch vs f32 reference"

    print("KERNEL_OK")
</pallas_src>

<mosaic_0001>
module attributes {stable_mosaic.version = 11 : i64} {
  func.func @_mlp_kernel(%arg0: i32, %arg1: memref<16x32xbf16, #tpu.memory_space<vmem>>, %arg2: memref<32x256xbf16, #tpu.memory_space<vmem>>, %arg3: memref<1x256xf32, #tpu.memory_space<vmem>>, %arg4: memref<256x128xbf16, #tpu.memory_space<vmem>>, %arg5: memref<1x128xf32, #tpu.memory_space<vmem>>, %arg6: memref<128x64xbf16, #tpu.memory_space<vmem>>, %arg7: memref<1x64xf32, #tpu.memory_space<vmem>>, %arg8: memref<64x128xbf16, #tpu.memory_space<vmem>>, %arg9: memref<1x128xf32, #tpu.memory_space<vmem>>, %arg10: memref<16x128xf32, #tpu.memory_space<vmem>>) attributes {dimension_semantics = [#tpu.dimension_semantics<parallel>], iteration_bounds = array<i64: 1>, scalar_prefetch = 0 : i64, scratch_operands = 0 : i64, tpu.core_type = #tpu.core_type<tc>, window_params = [{transform_indices = @transform_0, window_bounds = array<i64: 16, 32>}, {pipeline_mode = #tpu.pipeline_mode<synchronous>, transform_indices = @transform_1, window_bounds = array<i64: 32, 256>}, {pipeline_mode = #tpu.pipeline_mode<synchronous>, transform_indices = @transform_2, window_bounds = array<i64: 1, 256>}, {pipeline_mode = #tpu.pipeline_mode<synchronous>, transform_indices = @transform_3, window_bounds = array<i64: 256, 128>}, {pipeline_mode = #tpu.pipeline_mode<synchronous>, transform_indices = @transform_4, window_bounds = array<i64: 1, 128>}, {pipeline_mode = #tpu.pipeline_mode<synchronous>, transform_indices = @transform_5, window_bounds = array<i64: 128, 64>}, {pipeline_mode = #tpu.pipeline_mode<synchronous>, transform_indices = @transform_6, window_bounds = array<i64: 1, 64>}, {pipeline_mode = #tpu.pipeline_mode<synchronous>, transform_indices = @transform_7, window_bounds = array<i64: 64, 128>}, {pipeline_mode = #tpu.pipeline_mode<synchronous>, transform_indices = @transform_8, window_bounds = array<i64: 1, 128>}, {transform_indices = @transform_9, window_bounds = array<i64: 16, 128>}]} {
    %c0 = arith.constant 0 : index
    %c0_0 = arith.constant 0 : index
    %0 = vector.load %arg1[%c0, %c0_0] : memref<16x32xbf16, #tpu.memory_space<vmem>>, vector<16x32xbf16>
    %c0_1 = arith.constant 0 : index
    %c0_2 = arith.constant 0 : index
    %1 = vector.load %arg2[%c0_1, %c0_2] : memref<32x256xbf16, #tpu.memory_space<vmem>>, vector<32x256xbf16>
    %cst = arith.constant dense<0.000000e+00> : vector<16x256xf32>
    %2 = tpu.matmul %0, %1, %cst {dimension_numbers = #tpu.dot_dimension_numbers<[1], [0], [0], [1], [0, 0, 1, 1], [], []>} : vector<16x32xbf16>, vector<32x256xbf16>, vector<16x256xf32> -> vector<16x256xf32>
    %c0_3 = arith.constant 0 : index
    %c0_4 = arith.constant 0 : index
    %3 = vector.load %arg3[%c0_3, %c0_4] : memref<1x256xf32, #tpu.memory_space<vmem>>, vector<1x256xf32>
    %4 = vector.broadcast %3 : vector<1x256xf32> to vector<16x256xf32>
    %5 = arith.addf %2, %4 : vector<16x256xf32>
    %cst_5 = arith.constant 0.000000e+00 : f32
    %6 = vector.broadcast %cst_5 : f32 to vector<16x256xf32>
    %7 = arith.maximumf %5, %6 : vector<16x256xf32>
    %8 = arith.truncf %7 : vector<16x256xf32> to vector<16x256xbf16>
    %c0_6 = arith.constant 0 : index
    %c0_7 = arith.constant 0 : index
    %9 = vector.load %arg4[%c0_6, %c0_7] : memref<256x128xbf16, #tpu.memory_space<vmem>>, vector<256x128xbf16>
    %cst_8 = arith.constant dense<0.000000e+00> : vector<16x128xf32>
    %10 = tpu.matmul %8, %9, %cst_8 {dimension_numbers = #tpu.dot_dimension_numbers<[1], [0], [0], [1], [0, 0, 1, 1], [], []>} : vector<16x256xbf16>, vector<256x128xbf16>, vector<16x128xf32> -> vector<16x128xf32>
    %c0_9 = arith.constant 0 : index
    %c0_10 = arith.constant 0 : index
    %11 = vector.load %arg5[%c0_9, %c0_10] : memref<1x128xf32, #tpu.memory_space<vmem>>, vector<1x128xf32>
    %12 = vector.broadcast %11 : vector<1x128xf32> to vector<16x128xf32>
    %13 = arith.addf %10, %12 : vector<16x128xf32>
    %cst_11 = arith.constant 0.000000e+00 : f32
    %14 = vector.broadcast %cst_11 : f32 to vector<16x128xf32>
    %15 = arith.maximumf %13, %14 : vector<16x128xf32>
    %16 = arith.truncf %15 : vector<16x128xf32> to vector<16x128xbf16>
    %c0_12 = arith.constant 0 : index
    %c0_13 = arith.constant 0 : index
    %17 = vector.load %arg6[%c0_12, %c0_13] : memref<128x64xbf16, #tpu.memory_space<vmem>>, vector<128x64xbf16>
    %cst_14 = arith.constant dense<0.000000e+00> : vector<16x64xf32>
    %18 = tpu.matmul %16, %17, %cst_14 {dimension_numbers = #tpu.dot_dimension_numbers<[1], [0], [0], [1], [0, 0, 1, 1], [], []>} : vector<16x128xbf16>, vector<128x64xbf16>, vector<16x64xf32> -> vector<16x64xf32>
    %c0_15 = arith.constant 0 : index
    %c0_16 = arith.constant 0 : index
    %19 = vector.load %arg7[%c0_15, %c0_16] : memref<1x64xf32, #tpu.memory_space<vmem>>, vector<1x64xf32>
    %20 = vector.broadcast %19 : vector<1x64xf32> to vector<16x64xf32>
    %21 = arith.addf %18, %20 : vector<16x64xf32>
    %cst_17 = arith.constant 0.000000e+00 : f32
    %22 = vector.broadcast %cst_17 : f32 to vector<16x64xf32>
    %23 = arith.maximumf %21, %22 : vector<16x64xf32>
    %24 = arith.truncf %23 : vector<16x64xf32> to vector<16x64xbf16>
    %c0_18 = arith.constant 0 : index
    %c0_19 = arith.constant 0 : index
    %25 = vector.load %arg8[%c0_18, %c0_19] : memref<64x128xbf16, #tpu.memory_space<vmem>>, vector<64x128xbf16>
    %cst_20 = arith.constant dense<0.000000e+00> : vector<16x128xf32>
    %26 = tpu.matmul %24, %25, %cst_20 {dimension_numbers = #tpu.dot_dimension_numbers<[1], [0], [0], [1], [0, 0, 1, 1], [], []>} : vector<16x64xbf16>, vector<64x128xbf16>, vector<16x128xf32> -> vector<16x128xf32>
    %c0_21 = arith.constant 0 : index
    %c0_22 = arith.constant 0 : index
    %27 = vector.load %arg9[%c0_21, %c0_22] : memref<1x128xf32, #tpu.memory_space<vmem>>, vector<1x128xf32>
    %28 = vector.broadcast %27 : vector<1x128xf32> to vector<16x128xf32>
    %29 = arith.addf %26, %28 : vector<16x128xf32>
    %c0_23 = arith.constant 0 : index
    %c0_24 = arith.constant 0 : index
    %30 = vector.load %arg10[%c0_23, %c0_24] : memref<16x128xf32, #tpu.memory_space<vmem>>, vector<16x128xf32>
    tpu.vector_store %arg10[%c0_23, %c0_24], %29 {strides = array<i32>} : memref<16x128xf32, #tpu.memory_space<vmem>>, vector<16x128xf32>,
    return
  }
  func.func @transform_0(%arg0: i32) -> (i32, i32) {
    %c0_i32 = arith.constant 0 : i32
    %c0_i32_0 = arith.constant 0 : i32
    return %arg0, %c0_i32 : i32, i32
  }
  func.func @transform_1(%arg0: i32) -> (i32, i32) {
    %c0_i32 = arith.constant 0 : i32
    %c0_i32_0 = arith.constant 0 : i32
    %c0_i32_1 = arith.constant 0 : i32
    return %c0_i32, %c0_i32_0 : i32, i32
  }
  func.func @transform_2(%arg0: i32) -> (i32, i32) {
    %c0_i32 = arith.constant 0 : i32
    %c0_i32_0 = arith.constant 0 : i32
    %c0_i32_1 = arith.constant 0 : i32
    return %c0_i32, %c0_i32_0 : i32, i32
  }
  func.func @transform_3(%arg0: i32) -> (i32, i32) {
    %c0_i32 = arith.constant 0 : i32
    %c0_i32_0 = arith.constant 0 : i32
    %c0_i32_1 = arith.constant 0 : i32
    return %c0_i32, %c0_i32_0 : i32, i32
  }
  func.func @transform_4(%arg0: i32) -> (i32, i32) {
    %c0_i32 = arith.constant 0 : i32
    %c0_i32_0 = arith.constant 0 : i32
    %c0_i32_1 = arith.constant 0 : i32
    return %c0_i32, %c0_i32_0 : i32, i32
  }
  func.func @transform_5(%arg0: i32) -> (i32, i32) {
    %c0_i32 = arith.constant 0 : i32
    %c0_i32_0 = arith.constant 0 : i32
    %c0_i32_1 = arith.constant 0 : i32
    return %c0_i32, %c0_i32_0 : i32, i32
  }
  func.func @transform_6(%arg0: i32) -> (i32, i32) {
    %c0_i32 = arith.constant 0 : i32
    %c0_i32_0 = arith.constant 0 : i32
    %c0_i32_1 = arith.constant 0 : i32
    return %c0_i32, %c0_i32_0 : i32, i32
  }
  func.func @transform_7(%arg0: i32) -> (i32, i32) {
    %c0_i32 = arith.constant 0 : i32
    %c0_i32_0 = arith.constant 0 : i32
    %c0_i32_1 = arith.constant 0 : i32
    return %c0_i32, %c0_i32_0 : i32, i32
  }
  func.func @transform_8(%arg0: i32) -> (i32, i32) {
    %c0_i32 = arith.constant 0 : i32
    %c0_i32_0 = arith.constant 0 : i32
    %c0_i32_1 = arith.constant 0 : i32
    return %c0_i32, %c0_i32_0 : i32, i32
  }
  func.func @transform_9(%arg0: i32) -> (i32, i32) {
    %c0_i32 = arith.constant 0 : i32
    %c0_i32_0 = arith.constant 0 : i32
    return %arg0, %c0_i32 : i32, i32
  }
}

</mosaic_0001>

<bundles_post_ra>
// kernel: tpu_custom_call.1
= control target key start
LH: loop header
LB: loop body
LE: loop exit
PB: predicated region body
PF: predicated region fallthrough
CT: control target
= control target key end

     0   :  { %14 = vsyncpa [#allocation3], 0  ;;  %s814_s0 = inlined_call_operand.vmem [shape: bf16[16,32], index: 0, kind: input, shape index: {}]   ;;  %s815_s1 = inlined_call_operand.vmem [shape: bf16[32,256], index: 1, kind: input, shape index: {}]   ;;  %s816_s2 = inlined_call_operand.vmem [shape: f32[1,256], index: 2, kind: input, shape index: {}]   ;;  %s817_s3 = inlined_call_operand.hbm [shape: bf16[256,128], index: 3, kind: input, shape index: {}]   ;;  %s818_s4 = inlined_call_operand.vmem [shape: f32[1,128], index: 4, kind: input, shape index: {}]   ;;  %s819_s5 = inlined_call_operand.vmem [shape: bf16[128,64], index: 5, kind: input, shape index: {}]   ;;  %s820_s6 = inlined_call_operand.vmem [shape: f32[1,64], index: 6, kind: input, shape index: {}]   ;;  %s821_s7 = inlined_call_operand.vmem [shape: bf16[64,128], index: 7, kind: input, shape index: {}]   ;;  %s822_s8 = inlined_call_operand.vmem [shape: f32[1,128], index: 8, kind: input, shape index: {}]   ;;  %s823_s9 = inlined_call_operand.hbm [shape: f32[16,128], index: 9, kind: output, shape index: {}]  }
   0x1   :  { %15 = vsyncpa [#allocation4], 0  ;;  %s26_s11 = sshll.u32 %s817_s3, 4  ;;  %s677_s12 = smov [#allocation2]   ;;  %s27_s11 = int_to_ptr.hbm [resolvable:$true] %s26_s11 }
   0x2   :  { %s28_s13 = sshll.u32 %s677_s12, 4  ;;  %s678_s14 = smov 64   ;;  %s29_s13 = int_to_ptr.vmem [resolvable:$true] %s28_s13 }
   0x3   :  { %s679_s15 = smov 4  }
   0x4   :  { %34 = dma.hbm_to_vmem [thread:$0]  %s27_s11, 2048, %s29_s13, [#allocation3], %s678_s14, %s678_s14, %s679_s15  }
   0x5   :  { %673 = dma.done.wait [#allocation3], 2048  }
   0x6   :  { %674 = vsyncadd [#allocation3], 4294965248  ;;  %v462_v0 = vld [vmem:[%s815_s1 + $0x10] sm:$0xf]  ;;  %v587_v1 = vld [vmem:[%s815_s1 + $0x14] sm:$0xf0] }
   0x7   :  { %v586_v2 = vld [vmem:[%s815_s1 + $0x14] sm:$0xf]  ;;  %v463_v3 = vor.u32 %v587_v1, %v462_v0  ;;  %v464_v4 = vld [vmem:[%s815_s1 + $0x18] sm:$0xf0]  ;;  %v454_v5 = vld [vmem:[%s815_s1] sm:$0xf] }
   0x8   :  { %v585_v6 = vld [vmem:[%s815_s1 + $0x4] sm:$0xf0]  ;;  %v467_v7 = vor.u32 %v586_v2, %v464_v4  ;;  %v584_v8 = vld [vmem:[%s815_s1 + $0x4] sm:$0xf]  ;;  %v456_v9 = vld [vmem:[%s815_s1 + $0x8] sm:$0xf0] }
   0x9   :  { %97 = vmatpush.bf16.msra.mxu0 %v463_v3  ;;  %v455_v10 = vor.u32 %v585_v6, %v454_v5  ;;  %v595_v11 = vld [vmem:[#allocation2 + $0x38] sm:$0xff]  ;;  %v459_v13 = vor.u32 %v584_v8, %v456_v9  ;;  %v594_v14 = vld [vmem:[#allocation2 + $0x30] sm:$0xff]  ;;  %v583_v16 = vld [vmem:[%s814_s0] sm:$0xff]  ;;  %vm87_vm0 = vcmask 261120   ;;  %vm409_vm1 = vcmask 523264   ;;  %s681_s18 = smov 128  }
   0xa   :  { %v603_v12 = vld [vmem:[#allocation2 + $0x78] sm:$0xff]  ;;  %111 = vmatpush.bf16.msra.mxu1 %v467_v7  ;;  %257 = vmatpush.bf16.msra.mxu2 %v595_v11  ;;  %v602_v15 = vld [vmem:[#allocation2 + $0x70] sm:$0xff]  ;;  %v593_v17 = vld [vmem:[#allocation2 + $0x28] sm:$0xff]  ;;  %s682_s19 = smov 8  }
   0xb   :  { %271 = vmatpush.bf16.msra.mxu3 %v603_v12  ;;  %v601_v18 = vld [vmem:[#allocation2 + $0x68] sm:$0xff]  ;;  %v592_v19 = vld [vmem:[#allocation2 + $0x20] sm:$0xff]  ;;  %v591_v21 = vld [vmem:[#allocation2 + $0x18] sm:$0xff] }
   0xc   :  { %v600_v20 = vld [vmem:[#allocation2 + $0x60] sm:$0xff]  ;;  %v599_v22 = vld [vmem:[#allocation2 + $0x58] sm:$0xff]  ;;  %v590_v23 = vld [vmem:[#allocation2 + $0x10] sm:$0xff] }
   0xd   :  { %98 = vmatpush.bf16.msra.mxu0 %v455_v10  ;;  %v598_v24 = vld [vmem:[#allocation2 + $0x50] sm:$0xff]  ;;  %v589_v25 = vld [vmem:[#allocation2 + $0x8] sm:$0xff]  ;;  %v588_v27 = vld [vmem:[#allocation2] sm:$0xff] }
   0xe   :  { %112 = vmatpush.bf16.msra.mxu1 %v459_v13  ;;  %258 = vmatpush.bf16.msra.mxu2 %v594_v14  ;;  %v597_v26 = vld [vmem:[#allocation2 + $0x48] sm:$0xff]  ;;  %v596_v28 = vld [vmem:[#allocation2 + $0x40] sm:$0xff]  ;;  %v611_v29 = vld [vmem:[%s819_s5 + $0x38] sm:$0xff] }
   0xf   :  { %272 = vmatpush.bf16.msra.mxu3 %v602_v15  ;;  %v610_v30 = vld [vmem:[%s819_s5 + $0x30] sm:$0xff]  ;;  %v609_v31 = vld [vmem:[%s819_s5 + $0x28] sm:$0xff]  ;;  %v608_v32 = vld [vmem:[%s819_s5 + $0x20] sm:$0xff] }
  0x10   :  { %468 = vmatmul.msk.bf16.vlgmr.msra.gmra.mxu0 %vm87_vm0, %v583_v16  ;;  %v56_v33 = vld [vmem:[%s816_s2] sm:$0x3]  ;;  %v607_v50 = vld [vmem:[%s819_s5 + $0x18] sm:$0xff]  ;;  %v606_v51 = vld [vmem:[%s819_s5 + $0x10] sm:$0xff] }
  0x11   :  { %469 = vmatmul.msk.bf16.vlgmr.msra.gmra.mxu1 %vm87_vm0, %v583_v16  ;;  %356 = vmatpush.bf16.msrb.mxu0 %v611_v29  ;;  %v58_v36 = vperm.slane %v56_v33, 0  ;;  %v59_v37 = vperm.slane %v56_v33, 1  ;;  %v605_v52 = vld [vmem:[%s819_s5 + $0x8] sm:$0xff]  ;;  %v604_v53 = vld [vmem:[%s819_s5] sm:$0xff]  ;;  %v615_v54 = vld [vmem:[%s821_s7 + $0x18] sm:$0xff] }
  0x12   :  { %259 = vmatpush.bf16.msra.mxu2 %v593_v17  ;;  %417 = vmatpush.bf16.msrb.mxu1 %v615_v54  ;;  %v622_v56 = vld [vmem:[%s818_s4] ss:$0 sm:$0xff]  ;;  %v614_v3 = vld [vmem:[%s821_s7 + $0x10] sm:$0xff]  ;;  %v613_v4 = vld [vmem:[%s821_s7 + $0x8] sm:$0xff] }
  0x13   :  { %273 = vmatpush.bf16.msra.mxu3 %v601_v18  ;;  %v612_v5 = vld [vmem:[%s821_s7] sm:$0xff]  ;;  %s680_s7 = smov [#allocation5]  }
  0x14   :  { %v623_v7 = vld [vmem:[%s820_s6] ss:$0 sm:$0xff]  ;;  %s433_s15 = sshll.u32 %s680_s7, 4  ;;  %s435_s6 = sshll.u32 %s823_s9, 4  ;;  %s434_s15 = int_to_ptr.vmem [resolvable:$true] %s433_s15  ;;  %s436_s6 = int_to_ptr.hbm [resolvable:$true] %s435_s6 }
  0x15   :  { %357 = vmatpush.bf16.msrb.mxu0 %v610_v30  ;;  %v624_v14 = vld [vmem:[%s822_s8] ss:$0 sm:$0xff] }
  0x16   :  { %260 = vmatpush.bf16.msra.mxu2 %v592_v19  ;;  %418 = vmatpush.bf16.msrb.mxu1 %v614_v3 }
  0x17   :  { %274 = vmatpush.bf16.msra.mxu3 %v600_v20 }
  0x19   :  { %358 = vmatpush.bf16.msrb.mxu0 %v609_v31 }
  0x1a   :  { %261 = vmatpush.bf16.msra.mxu2 %v591_v21  ;;  %419 = vmatpush.bf16.msrb.mxu1 %v613_v4 }
  0x1b   :  { %275 = vmatpush.bf16.msra.mxu3 %v599_v22 }
  0x1d   :  { %359 = vmatpush.bf16.msrb.mxu0 %v608_v32 }
  0x1e   :  { %262 = vmatpush.bf16.msra.mxu2 %v590_v23  ;;  %420 = vmatpush.bf16.msrb.mxu1 %v612_v5 }
  0x1f   :  { %276 = vmatpush.bf16.msra.mxu3 %v598_v24 }
  0x21   :  { %360 = vmatpush.bf16.msrb.mxu0 %v607_v50 }
  0x22   :  { %263 = vmatpush.bf16.msra.mxu2 %v589_v25 }
  0x23   :  { %277 = vmatpush.bf16.msra.mxu3 %v597_v26 }
  0x25   :  { %361 = vmatpush.bf16.msrb.mxu0 %v606_v51 }
  0x26   :  { %264 = vmatpush.bf16.msra.mxu2 %v588_v27 }
  0x27   :  { %278 = vmatpush.bf16.msra.mxu3 %v596_v28 }
  0x29   :  { %362 = vmatpush.bf16.msrb.mxu0 %v605_v52 }
  0x2d   :  { %363 = vmatpush.bf16.msrb.mxu0 %v604_v53 }
  0x8d   :  { %v100_v34 = vpop.f32.mrf.mxu0 }
  0x8e   :  { %v114_v35 = vpop.f32.mrf.mxu1  ;;  %v101_v38 = vadd.f32 %v100_v34, %v58_v36 }
  0x8f   :  { %v115_v39 = vadd.f32 %v114_v35, %v59_v37 }
  0x90   :  { %v119_v44 = vmax.f32 %v101_v38, 0.0 }
  0x91   :  { %v120_v46 = vmax.f32 %v115_v39, 0.0 }
  0x95   :  { %v102_v40 = vpop.f32.mrf.mxu0 }
  0x96   :  { %v103_v41 = vadd.f32 %v102_v40, %v58_v36  ;;  %v116_v42 = vpop.f32.mrf.mxu1 }
  0x97   :  { %v117_v43 = vadd.f32 %v116_v42, %v59_v37 }
  0x98   :  { %v121_v45 = vmax.f32 %v103_v41, 0.0 }
  0x99   :  { %v122_v47 = vmax.f32 %v117_v43, 0.0 }
  0x9a   :  { %v123_v48 = vpack.c.bf16 %v121_v45, %v119_v44 }
  0x9b   :  { %v124_v49 = vpack.c.bf16 %v122_v47, %v120_v46 }
  0x9c   :  { %265 = vmatmul.bf16.vlgmr.msra.gmra.mxu2 %v123_v48 }
  0x9d   :  { %279 = vmatmul.bf16.vlgmr.msra.gmra.mxu3 %v124_v49 }
 0x11f   :  { %v266_v55 = vpop.f32.mrf.mxu2 }
 0x120   :  { %v280_v57 = vpop.f32.mrf.mxu3  ;;  %v267_v58 = vadd.f32 %v622_v56, %v266_v55 }
 0x122   :  { %v281_v60 = vadd.f32 %v280_v57, %v267_v58 }
 0x124   :  { %v285_v0 = vmax.f32 %v281_v60, 0.0 }
 0x127   :  { %v268_v59 = vpop.f32.mrf.mxu2 }
 0x128   :  { %v269_v61 = vadd.f32 %v622_v56, %v268_v59  ;;  %v282_v62 = vpop.f32.mrf.mxu3 }
 0x12a   :  { %v283_v63 = vadd.f32 %v282_v62, %v269_v61 }
 0x12c   :  { %v286_v1 = vmax.f32 %v283_v63, 0.0 }
 0x12e   :  { %v287_v2 = vpack.c.bf16 %v286_v1, %v285_v0 }
 0x130   :  { %364 = vmatmul.bf16.vlgmr.msrb.gmra.mxu0 %v287_v2 }
 0x1ad   :  { %v365_v6 = vpop.f32.mrf.mxu0 }
 0x1ae   :  { %v366_v8 = vadd.f32 %v623_v7, %v365_v6 }
 0x1b0   :  { %v370_v11 = vmax.f32 %v366_v8, 0.0 }
 0x1b5   :  { %v367_v9 = vpop.f32.mrf.mxu0 }
 0x1b6   :  { %v368_v10 = vadd.f32 %v623_v7, %v367_v9 }
 0x1b8   :  { %v371_v12 = vmax.f32 %v368_v10, 0.0 }
 0x1ba   :  { %v372_v13 = vpack.c.bf16 %v371_v12, %v370_v11 }
 0x1bc   :  { %582 = vmatmul.msk.bf16.vlgmr.msrb.gmra.mxu1 %vm409_vm1, %v372_v13 }
 0x239   :  { %v422_v15 = vpop.f32.mrf.mxu1 }
 0x23a   :  { %v423_v16 = vadd.f32 %v624_v14, %v422_v15 }
 0x23c   :  { %427 = vst [vmem:[#allocation5] sm:$0xff] %v423_v16 }
 0x241   :  { %v424_v17 = vpop.f32.mrf.mxu1 }
 0x242   :  { %v425_v18 = vadd.f32 %v624_v14, %v424_v17 }
 0x244   :  { %428 = vst [vmem:[#allocation5 + $0x8] sm:$0xff] %v425_v18 }
 0x245   :  { %441 = dma.vmem_to_hbm [thread:$0]  %s434_s15, 256, %s436_s6, [#allocation4], %s681_s18, %s681_s18, %s682_s19  }
 0x246   :  { %675 = dma.done.wait [#allocation4], 256  }
 0x247   :  { %676 = vsyncadd [#allocation4], 4294967040 }
 0x248   :  { %446 = vsyncpa [#allocation3], 1 }
 0x249   :  { %447 = vsyncpa [#allocation4], 1 }

</bundles_post_ra>
